<compile_context>
chip_gen: v5e
topology: v5e:2x2
jax: 0.10.0
libtpu: 0.0.40
codegen_flags: <defaults>
</compile_context>

<pallas_src>
import functools

import jax
import jax.numpy as jnp
from jax.experimental import pallas as pl
from jax.experimental.pallas import tpu as pltpu

EPS = 1e-5
IN_FEATURES = 64
OUT_FEATURES = 32


def _round_up(v, m):
    return ((v + m - 1) // m) * m


def _mlp3a_kernel(x_ref, wt_ref, gamma_ref, beta_ref, o_ref,
                  y_buf, stats, scale_shift, *, block_rows, inv_n):
    phase = pl.program_id(0)   # 0 = matmul + stats accumulation, 1 = normalize + store
    i = pl.program_id(1)       # batch-tile index

    @pl.when(phase == 0)
    def _matmul_and_stats():
        @pl.when(i == 0)
        def _init():
            stats[...] = jnp.zeros_like(stats)

        # Linear without bias (bias is algebraically dead under BatchNorm).
        y = jnp.dot(x_ref[...], wt_ref[...], preferred_element_type=jnp.float32)

        # Cache y in persistent VMEM so phase 1 never re-reads x from HBM.
        row0 = pl.multiple_of(i * block_rows, block_rows)
        y_buf[pl.ds(row0, block_rows), :] = y

        # Full-batch BN statistics: per-feature sum and sum of squares.
        stats[0:1, :] += jnp.sum(y, axis=0, keepdims=True)
        stats[1:2, :] += jnp.sum(y * y, axis=0, keepdims=True)

    @pl.when(phase == 1)
    def _normalize_and_store():
        @pl.when(i == 0)
        def _finalize_stats():
            mean = stats[0:1, :] * inv_n
            var = jnp.maximum(stats[1:2, :] * inv_n - mean * mean, 0.0)
            scale = gamma_ref[...] * jax.lax.rsqrt(var + EPS)   # rsqrt -> EUP slot
            scale_shift[0:1, :] = scale
            scale_shift[1:2, :] = beta_ref[...] - mean * scale

        row0 = pl.multiple_of(i * block_rows, block_rows)
        y = y_buf[pl.ds(row0, block_rows), :]
        # Fused BN + ReLU epilogue: one FMA + one max over the tile.
        out = jnp.maximum(y * scale_shift[0:1, :] + scale_shift[1:2, :], 0.0)
        o_ref[...] = out.astype(o_ref.dtype)


def mlp3a_forward(x, w, b, gamma, beta, *, block_rows=None):
    """x: (N, 64); w: (32, 64); b, gamma, beta: (32,). Returns (N, 32) f32.

    `b` is accepted for interface parity but never touches the kernel: the BN
    mean subtraction removes it exactly.
    """
    n = x.shape[0]
    assert x.shape[1] == IN_FEATURES
    del b  # algebraically eliminated by BatchNorm

    x = x.astype(jnp.float32)
    wt = w.T.astype(jnp.float32)                              # (64, 32)
    g2 = gamma.reshape(1, OUT_FEATURES).astype(jnp.float32)
    be2 = beta.reshape(1, OUT_FEATURES).astype(jnp.float32)

    # Batch tile: multiple of 8 sublanes, capped so x/y tiles pipeline well.
    if block_rows is None:
        block_rows = min(512, _round_up(n, 8))
    block_rows = max(8, _round_up(block_rows, 8))
    n_pad = _round_up(n, block_rows)
    if n_pad != n:
        x = jnp.pad(x, ((0, n_pad - n), (0, 0)))              # exact (see header)
    nt = n_pad // block_rows

    kernel = functools.partial(
        _mlp3a_kernel, block_rows=block_rows, inv_n=1.0 / float(n))

    # VMEM budget: persistent y buffer + double-buffered x/out tiles + params.
    y_buf_bytes = n_pad * OUT_FEATURES * 4
    tile_bytes = 2 * (block_rows * IN_FEATURES * 4) + 2 * (block_rows * OUT_FEATURES * 4)
    vmem_limit = int(min(max(y_buf_bytes + tile_bytes + (2 << 20), 16 << 20), 60 << 20))

    out_padded = pl.pallas_call(
        kernel,
        out_shape=jax.ShapeDtypeStruct((n_pad, OUT_FEATURES), jnp.float32),
        grid_spec=pltpu.PrefetchScalarGridSpec(
            num_scalar_prefetch=0,
            grid=(2, nt),                                     # (phase, batch tile)
            in_specs=[
                # x: stream tiles in phase 0; park on the last tile in phase 1
                # so it is never re-fetched from HBM.
                pl.BlockSpec((block_rows, IN_FEATURES),
                             lambda p, i: (i * (1 - p) + (nt - 1) * p, 0)),
                pl.BlockSpec((IN_FEATURES, OUT_FEATURES), lambda p, i: (0, 0)),
                pl.BlockSpec((1, OUT_FEATURES), lambda p, i: (0, 0)),
                pl.BlockSpec((1, OUT_FEATURES), lambda p, i: (0, 0)),
            ],
            # out: park on block 0 during phase 0 (never flushed, never written),
            # then stream one tile per phase-1 step.
            out_specs=pl.BlockSpec((block_rows, OUT_FEATURES),
                                   lambda p, i: (i * p, 0)),
            scratch_shapes=[
                pltpu.VMEM((n_pad, OUT_FEATURES), jnp.float32),   # resident y
                pltpu.VMEM((2, OUT_FEATURES), jnp.float32),       # [sum; sumsq]
                pltpu.VMEM((2, OUT_FEATURES), jnp.float32),       # [scale; shift]
            ],
        ),
        compiler_params=pltpu.CompilerParams(
            # Both axes sequential: BN statistics couple all batch tiles.
            dimension_semantics=("arbitrary", "arbitrary"),
            vmem_limit_bytes=vmem_limit,
        ),
    )(x, wt, g2, be2)

    return out_padded[:n]


def reference_forward(x, w, b, gamma, beta):
    """Pure-JAX reference mirroring PyTorch semantics (training-mode BN, with bias)."""
    y = x @ w.T + b
    mean = jnp.mean(y, axis=0, keepdims=True)
    var = jnp.mean((y - mean) ** 2, axis=0, keepdims=True)
    y = (y - mean) / jnp.sqrt(var + EPS)
    y = y * gamma + beta
    return jnp.maximum(y, 0.0)


if __name__ == "__main__":
    key = jax.random.PRNGKey(0)
    k_x, k_w, k_b, k_g, k_be = jax.random.split(key, 5)

    N = 64  # small demo batch; block_rows=16 below exercises the multi-tile path
    x = jax.random.normal(k_x, (N, IN_FEATURES), dtype=jnp.float32)

    bound = 1.0 / jnp.sqrt(jnp.float32(IN_FEATURES))
    w = jax.random.uniform(k_w, (OUT_FEATURES, IN_FEATURES),
                           minval=-bound, maxval=bound, dtype=jnp.float32)
    b = jax.random.uniform(k_b, (OUT_FEATURES,),
                           minval=-bound, maxval=bound, dtype=jnp.float32)
    gamma = jax.random.uniform(k_g, (OUT_FEATURES,),
                               minval=0.5, maxval=1.5, dtype=jnp.float32)
    beta = 0.1 * jax.random.normal(k_be, (OUT_FEATURES,), dtype=jnp.float32)

    out = mlp3a_forward(x, w, b, gamma, beta, block_rows=16)   # nt = 4 tiles
    out = jax.block_until_ready(out)

    ref = reference_forward(x, w, b, gamma, beta)
    assert out.shape == (N, OUT_FEATURES)
    assert jnp.allclose(out, ref, atol=1e-4, rtol=1e-4), \
        float(jnp.max(jnp.abs(out - ref)))

    # Also exercise the zero-padding path (N not a multiple of the tile).
    N2 = 50
    x2 = x[:N2]
    out2 = jax.block_until_ready(mlp3a_forward(x2, w, b, gamma, beta, block_rows=16))
    ref2 = reference_forward(x2, w, b, gamma, beta)
    assert out2.shape == (N2, OUT_FEATURES)
    assert jnp.allclose(out2, ref2, atol=1e-4, rtol=1e-4), \
        float(jnp.max(jnp.abs(out2 - ref2)))

    print("KERNEL_OK")
</pallas_src>

<mosaic_0001>
module attributes {stable_mosaic.version = 11 : i64} {
  func.func @_mlp3a_kernel(%arg0: i32, %arg1: i32, %arg2: memref<16x64xf32, #tpu.memory_space<vmem>>, %arg3: memref<64x32xf32, #tpu.memory_space<vmem>>, %arg4: memref<1x32xf32, #tpu.memory_space<vmem>>, %arg5: memref<1x32xf32, #tpu.memory_space<vmem>>, %arg6: memref<16x32xf32, #tpu.memory_space<vmem>>, %arg7: memref<64x32xf32, #tpu.memory_space<vmem>>, %arg8: memref<2x32xf32, #tpu.memory_space<vmem>>, %arg9: memref<2x32xf32, #tpu.memory_space<vmem>>) attributes {dimension_semantics = [#tpu.dimension_semantics<arbitrary>, #tpu.dimension_semantics<arbitrary>], iteration_bounds = array<i64: 2, 4>, scalar_prefetch = 0 : i64, scratch_operands = 3 : i64, tpu.core_type = #tpu.core_type<tc>, window_params = [{transform_indices = @transform_0, window_bounds = array<i64: 16, 64>}, {pipeline_mode = #tpu.pipeline_mode<synchronous>, transform_indices = @transform_1, window_bounds = array<i64: 64, 32>}, {pipeline_mode = #tpu.pipeline_mode<synchronous>, transform_indices = @transform_2, window_bounds = array<i64: 1, 32>}, {pipeline_mode = #tpu.pipeline_mode<synchronous>, transform_indices = @transform_3, window_bounds = array<i64: 1, 32>}, {transform_indices = @transform_4, window_bounds = array<i64: 16, 32>}]} {
    %c0_i32 = arith.constant 0 : i32
    %0 = arith.cmpi eq, %arg0, %c0_i32 : i32
    %1 = arith.extui %0 : i1 to i32
    %c0_i32_0 = arith.constant 0 : i32
    %2 = arith.cmpi ne, %1, %c0_i32_0 : i32
    scf.if %2 {
      %c0_i32_2 = arith.constant 0 : i32
      %6 = arith.cmpi eq, %arg1, %c0_i32_2 : i32
      %7 = arith.extui %6 : i1 to i32
      %c0_i32_3 = arith.constant 0 : i32
      %8 = arith.cmpi ne, %7, %c0_i32_3 : i32
      scf.if %8 {
        %cst_17 = arith.constant 0.000000e+00 : f32
        %27 = vector.broadcast %cst_17 : f32 to vector<2x32xf32>
        %c0_18 = arith.constant 0 : index
        %c0_19 = arith.constant 0 : index
        %28 = vector.load %arg8[%c0_18, %c0_19] : memref<2x32xf32, #tpu.memory_space<vmem>>, vector<2x32xf32>
        tpu.vector_store %arg8[%c0_18, %c0_19], %27 {strides = array<i32>} : memref<2x32xf32, #tpu.memory_space<vmem>>, vector<2x32xf32>,
      } else {
      }
      %c0 = arith.constant 0 : index
      %c0_4 = arith.constant 0 : index
      %9 = vector.load %arg2[%c0, %c0_4] : memref<16x64xf32, #tpu.memory_space<vmem>>, vector<16x64xf32>
      %c0_5 = arith.constant 0 : index
      %c0_6 = arith.constant 0 : index
      %10 = vector.load %arg3[%c0_5, %c0_6] : memref<64x32xf32, #tpu.memory_space<vmem>>, vector<64x32xf32>
      %cst = arith.constant dense<0.000000e+00> : vector<16x32xf32>
      %11 = tpu.matmul %9, %10, %cst {dimension_numbers = #tpu.dot_dimension_numbers<[1], [0], [0], [1], [0, 0, 1, 1], [], []>} : vector<16x64xf32>, vector<64x32xf32>, vector<16x32xf32> -> vector<16x32xf32>
      %c16_i32 = arith.constant 16 : i32
      %12 = arith.muli %arg1, %c16_i32 : i32
      %13 = tpu.assume_multiple %12, 16 : i32
      %14 = arith.index_cast %13 : i32 to index
      %c0_7 = arith.constant 0 : index
      %15 = vector.load %arg7[%14, %c0_7] : memref<64x32xf32, #tpu.memory_space<vmem>>, vector<16x32xf32>
      tpu.vector_store %arg7[%14, %c0_7], %11 {strides = array<i32>} : memref<64x32xf32, #tpu.memory_space<vmem>>, vector<16x32xf32>,
      %c0_8 = arith.constant 0 : index
      %c0_9 = arith.constant 0 : index
      %16 = vector.load %arg8[%c0_8, %c0_9] : memref<2x32xf32, #tpu.memory_space<vmem>>, vector<1x32xf32>
      %cst_10 = arith.constant dense<0.000000e+00> : vector<32xf32>
      %17 = vector.multi_reduction <add>, %11, %cst_10 [0] : vector<16x32xf32> to vector<32xf32>
      %18 = vector.shape_cast %17 : vector<32xf32> to vector<1x32xf32>
      %19 = arith.addf %16, %18 : vector<1x32xf32>
      %c0_11 = arith.constant 0 : index
      %c0_12 = arith.constant 0 : index
      %20 = vector.load %arg8[%c0_11, %c0_12] : memref<2x32xf32, #tpu.memory_space<vmem>>, vector<1x32xf32>
      tpu.vector_store %arg8[%c0_11, %c0_12], %19 {strides = array<i32>} : memref<2x32xf32, #tpu.memory_space<vmem>>, vector<1x32xf32>,
      %c1 = arith.constant 1 : index
      %c0_13 = arith.constant 0 : index
      %21 = vector.load %arg8[%c1, %c0_13] : memref<2x32xf32, #tpu.memory_space<vmem>>, vector<1x32xf32>
      %22 = arith.mulf %11, %11 : vector<16x32xf32>
      %cst_14 = arith.constant dense<0.000000e+00> : vector<32xf32>
      %23 = vector.multi_reduction <add>, %22, %cst_14 [0] : vector<16x32xf32> to vector<32xf32>
      %24 = vector.shape_cast %23 : vector<32xf32> to vector<1x32xf32>
      %25 = arith.addf %21, %24 : vector<1x32xf32>
      %c1_15 = arith.constant 1 : index
      %c0_16 = arith.constant 0 : index
      %26 = vector.load %arg8[%c1_15, %c0_16] : memref<2x32xf32, #tpu.memory_space<vmem>>, vector<1x32xf32>
      tpu.vector_store %arg8[%c1_15, %c0_16], %25 {strides = array<i32>} : memref<2x32xf32, #tpu.memory_space<vmem>>, vector<1x32xf32>,
    } else {
    }
    %c1_i32 = arith.constant 1 : i32
    %3 = arith.cmpi eq, %arg0, %c1_i32 : i32
    %4 = arith.extui %3 : i1 to i32
    %c0_i32_1 = arith.constant 0 : i32
    %5 = arith.cmpi ne, %4, %c0_i32_1 : i32
    scf.if %5 {
      %c0_i32_2 = arith.constant 0 : i32
      %6 = arith.cmpi eq, %arg1, %c0_i32_2 : i32
      %7 = arith.extui %6 : i1 to i32
      %c0_i32_3 = arith.constant 0 : i32
      %8 = arith.cmpi ne, %7, %c0_i32_3 : i32
      scf.if %8 {
        %c0_9 = arith.constant 0 : index
        %c0_10 = arith.constant 0 : index
        %22 = vector.load %arg8[%c0_9, %c0_10] : memref<2x32xf32, #tpu.memory_space<vmem>>, vector<1x32xf32>
        %cst_11 = arith.constant 1.562500e-02 : f32
        %23 = vector.broadcast %cst_11 : f32 to vector<1x32xf32>
        %24 = arith.mulf %22, %23 : vector<1x32xf32>
        %c1_12 = arith.constant 1 : index
        %c0_13 = arith.constant 0 : index
        %25 = vector.load %arg8[%c1_12, %c0_13] : memref<2x32xf32, #tpu.memory_space<vmem>>, vector<1x32xf32>
        %cst_14 = arith.constant 1.562500e-02 : f32
        %26 = vector.broadcast %cst_14 : f32 to vector<1x32xf32>
        %27 = arith.mulf %25, %26 : vector<1x32xf32>
        %28 = arith.mulf %24, %24 : vector<1x32xf32>
        %29 = arith.subf %27, %28 : vector<1x32xf32>
        %cst_15 = arith.constant 0.000000e+00 : f32
        %30 = vector.broadcast %cst_15 : f32 to vector<1x32xf32>
        %31 = arith.maximumf %29, %30 : vector<1x32xf32>
        %c0_16 = arith.constant 0 : index
        %c0_17 = arith.constant 0 : index
        %32 = vector.load %arg4[%c0_16, %c0_17] : memref<1x32xf32, #tpu.memory_space<vmem>>, vector<1x32xf32>
        %cst_18 = arith.constant 9.99999974E-6 : f32
        %33 = vector.broadcast %cst_18 : f32 to vector<1x32xf32>
        %34 = arith.addf %31, %33 : vector<1x32xf32>
        %35 = math.rsqrt %34 : vector<1x32xf32>
        %36 = arith.mulf %32, %35 : vector<1x32xf32>
        %c0_19 = arith.constant 0 : index
        %c0_20 = arith.constant 0 : index
        %37 = vector.load %arg9[%c0_19, %c0_20] : memref<2x32xf32, #tpu.memory_space<vmem>>, vector<1x32xf32>
        tpu.vector_store %arg9[%c0_19, %c0_20], %36 {strides = array<i32>} : memref<2x32xf32, #tpu.memory_space<vmem>>, vector<1x32xf32>,
        %c0_21 = arith.constant 0 : index
        %c0_22 = arith.constant 0 : index
        %38 = vector.load %arg5[%c0_21, %c0_22] : memref<1x32xf32, #tpu.memory_space<vmem>>, vector<1x32xf32>
        %39 = arith.mulf %24, %36 : vector<1x32xf32>
        %40 = arith.subf %38, %39 : vector<1x32xf32>
        %c1_23 = arith.constant 1 : index
        %c0_24 = arith.constant 0 : index
        %41 = vector.load %arg9[%c1_23, %c0_24] : memref<2x32xf32, #tpu.memory_space<vmem>>, vector<1x32xf32>
        tpu.vector_store %arg9[%c1_23, %c0_24], %40 {strides = array<i32>} : memref<2x32xf32, #tpu.memory_space<vmem>>, vector<1x32xf32>,
      } else {
      }
      %c16_i32 = arith.constant 16 : i32
      %9 = arith.muli %arg1, %c16_i32 : i32
      %10 = tpu.assume_multiple %9, 16 : i32
      %11 = arith.index_cast %10 : i32 to index
      %c0 = arith.constant 0 : index
      %12 = vector.load %arg7[%11, %c0] : memref<64x32xf32, #tpu.memory_space<vmem>>, vector<16x32xf32>
      %c0_4 = arith.constant 0 : index
      %c0_5 = arith.constant 0 : index
      %13 = vector.load %arg9[%c0_4, %c0_5] : memref<2x32xf32, #tpu.memory_space<vmem>>, vector<1x32xf32>
      %14 = vector.broadcast %13 : vector<1x32xf32> to vector<16x32xf32>
      %15 = arith.mulf %12, %14 : vector<16x32xf32>
      %c1 = arith.constant 1 : index
      %c0_6 = arith.constant 0 : index
      %16 = vector.load %arg9[%c1, %c0_6] : memref<2x32xf32, #tpu.memory_space<vmem>>, vector<1x32xf32>
      %17 = vector.broadcast %16 : vector<1x32xf32> to vector<16x32xf32>
      %18 = arith.addf %15, %17 : vector<16x32xf32>
      %cst = arith.constant 0.000000e+00 : f32
      %19 = vector.broadcast %cst : f32 to vector<16x32xf32>
      %20 = arith.maximumf %18, %19 : vector<16x32xf32>
      %c0_7 = arith.constant 0 : index
      %c0_8 = arith.constant 0 : index
      %21 = vector.load %arg6[%c0_7, %c0_8] : memref<16x32xf32, #tpu.memory_space<vmem>>, vector<16x32xf32>
      tpu.vector_store %arg6[%c0_7, %c0_8], %20 {strides = array<i32>} : memref<16x32xf32, #tpu.memory_space<vmem>>, vector<16x32xf32>,
    } else {
    }
    return
  }
  func.func @transform_0(%arg0: i32, %arg1: i32) -> (i32, i32) {
    %c1_i32 = arith.constant 1 : i32
    %0 = arith.subi %c1_i32, %arg0 : i32
    %1 = arith.muli %arg1, %0 : i32
    %c3_i32 = arith.constant 3 : i32
    %2 = arith.muli %c3_i32, %arg0 : i32
    %3 = arith.addi %1, %2 : i32
    %c0_i32 = arith.constant 0 : i32
    %c0_i32_0 = arith.constant 0 : i32
    return %3, %c0_i32 : i32, i32
  }
  func.func @transform_1(%arg0: i32, %arg1: i32) -> (i32, i32) {
    %c0_i32 = arith.constant 0 : i32
    %c0_i32_0 = arith.constant 0 : i32
    %c0_i32_1 = arith.constant 0 : i32
    return %c0_i32, %c0_i32_0 : i32, i32
  }
  func.func @transform_2(%arg0: i32, %arg1: i32) -> (i32, i32) {
    %c0_i32 = arith.constant 0 : i32
    %c0_i32_0 = arith.constant 0 : i32
    %c0_i32_1 = arith.constant 0 : i32
    return %c0_i32, %c0_i32_0 : i32, i32
  }
  func.func @transform_3(%arg0: i32, %arg1: i32) -> (i32, i32) {
    %c0_i32 = arith.constant 0 : i32
    %c0_i32_0 = arith.constant 0 : i32
    %c0_i32_1 = arith.constant 0 : i32
    return %c0_i32, %c0_i32_0 : i32, i32
  }
  func.func @transform_4(%arg0: i32, %arg1: i32) -> (i32, i32) {
    %0 = arith.muli %arg1, %arg0 : i32
    %c0_i32 = arith.constant 0 : i32
    %c0_i32_0 = arith.constant 0 : i32
    return %0, %c0_i32 : i32, i32
  }
}

</mosaic_0001>

<bundles_post_ra>
// kernel: tpu_custom_call.1
= control target key start
LH: loop header
LB: loop body
LE: loop exit
PB: predicated region body
PF: predicated region fallthrough
CT: control target
= control target key end

     0   :  { %s592_s15 = smov 0   ;;  %s594_s16 = smov 0   ;;  %s696_s0 = inlined_call_operand.vmem [shape: f32[64,64], index: 0, kind: input, shape index: {}]   ;;  %s697_s1 = inlined_call_operand.vmem [shape: f32[64,32], index: 1, kind: input, shape index: {}]   ;;  %s698_s2 = inlined_call_operand.vmem [shape: f32[1,32], index: 2, kind: input, shape index: {}]   ;;  %s699_s3 = inlined_call_operand.vmem [shape: f32[1,32], index: 3, kind: input, shape index: {}]   ;;  %s700_s4 = inlined_call_operand.vmem [shape: f32[64,32], index: 4, kind: output, shape index: {}]  }
   0x1   :  { %s596_s17 = smov 0   ;;  %s598_s18 = smov 0  }
   0x2   :  { %s600_s19 = smov 0  }
   0x3 LB: > { %s23_s20 = sadd.s32 1, %s556_s17  ;;  %s26_s21 = sadd.s32 1, %s560_s18  ;;  %s564_s19 = sphi %s600_s19, %s14_s19   ;;  %s560_s18 = sphi %s598_s18, %s704_s18   ;;  %s556_s17 = sphi %s596_s17, %s703_s17   ;;  %s552_s16 = sphi %s594_s16, %s702_s16   ;;  %s548_s15 = sphi %s592_s15, %s701_s15  }
   0x4   : > { %p24_p0 = scmp.ge.s32.totalorder %s23_s20, 4  ;;  %p458_p1 = scmp.ge.s32.totalorder %s564_s19, 1 }
   0x5   : > { %p193_p2 = scmp.lt.s32.totalorder %s564_s19, 9 }
   0x6   : > { %s706_s20 = smov (%p24_p0, %s23_s20), 0  ;;  %s708_s21 = smov (!%p24_p0, %s26_s21), %s560_s18 }
   0x7   : > { %p194_p3 = pnand %p458_p1, %p193_p2  ;;  %p28_p4 = scmp.ge.s32.totalorder %s708_s21, 2 }
   0x8   : > { %s224_s22 = ssub.s32 (!%p194_p3), 1, %s552_s16  ;;  %s226_s23 = smul.u32 (!%p194_p3), 3, %s552_s16 }
   0x9   : > { %s710_s21 = smov (%p28_p4, %s708_s21), 0  ;;  %197 = sbr.rel (%p194_p3) target bundleno = 250 (0xfa), region = 36 }
   0xa   : > { %s225_s24 = smul.u32 (!%p194_p3), %s548_s15, %s224_s22  ;;  %p463_p7 = scmp.ne.s32.totalorder (!%p194_p3), %s552_s16, 0 }
   0xb   : > { %s238_s25 = smul.u32 (!%p194_p3), %s548_s15, %s552_s16 }
   0xc   : > { %s227_s26 = sadd.s32 (!%p194_p3), %s226_s23, %s225_s24 }
   0xd   : > { %s459_s27 = sshll.u32 (!%p194_p3), %s227_s26, 1  ;;  %s461_s28 = sshll.u32 (!%p194_p3), %s238_s25, 1 }
   0xe   : > { %p229_p5 = scmp.lt.s32.totalorder %s459_s27, 7  ;;  %p240_p6 = scmp.lt.s32.totalorder %s461_s28, 7 }
   0xf   : > { %249 = sbr.rel (%p463_p7) target bundleno = 189 (0xbd), region = 40  ;;  %p464_p8 = scmp.ne.s32.totalorder (!%p463_p7), %s548_s15, 0 }
  0x10   : > { %s712_s27 = smov (!%p229_p5, %s459_s27), 7  ;;  %s714_s28 = smov (!%p240_p6, %s461_s28), 7 }
  0x11   : > { %s460_s29 = sshll.u32 %s712_s27, 3  ;;  %s462_s7 = sshll.u32 %s714_s28, 3 }
  0x12   : > { %s634_s6 = scalar_lea.vmem %s696_s0, %s460_s29  ;;  %s639_s10 = scalar_lea.vmem %s700_s4, %s462_s7 }
  0x14   : > { %253 = sbr.rel (%p464_p8) target bundleno = 27 (0x1b), region = 44 }
  0x19   : > { %vm254_vm0 = vcmask 254976   ;;  %v566_v0 = vmov 0.0  }
  0x1a   : > { %255 = vst.msk [vmem:[#allocation3] sm:$0x3] %vm254_vm0, %v566_v0 }
  0x1b PF: > { %v265_v1 = vld [vmem:[%s697_s1 + $0x38] sm:$0xff]  ;;  %v264_v2 = vld [vmem:[%s697_s1 + $0x30] sm:$0xff]  ;;  %v263_v3 = vld [vmem:[%s697_s1 + $0x28] sm:$0xff]  ;;  %vm266_vm1 = vcmask 523264   ;;  %s467_s9 = sshll.u32 %s548_s15, 4  ;;  %vm298_vm2 = vcmask 261120  }
  0x1c   : > { %281 = vmatpush.msra.mxu0 %v265_v1  ;;  %473 = vmatpush.msra.mxu1 %v265_v1  ;;  %v262_v4 = vld [vmem:[%s697_s1 + $0x20] sm:$0xff]  ;;  %v261_v5 = vld [vmem:[%s697_s1 + $0x18] sm:$0xff]  ;;  %v260_v6 = vld [vmem:[%s697_s1 + $0x10] sm:$0xff]  ;;  %s297_s11 = scalar_lea.vmem [#allocation2], %s467_s9  ;;  %vm312_vm3 = vcmask 253952  }
  0x1d   : > { %v259_v7 = vld [vmem:[%s697_s1 + $0x8] sm:$0xff]  ;;  %v258_v8 = vld [vmem:[%s697_s1] sm:$0xff] }
  0x1e   : > { %282 = vmatpush.msra.mxu0 %v264_v2  ;;  %474 = vmatpush.msra.mxu1 %v264_v2  ;;  %v256_v9 = vld [vmem:[%s634_s6] sm:$0xff]  ;;  %v257_v10 = vld [vmem:[%s634_s6 + $0x8] sm:$0xff] }
  0x20   : > { %283 = vmatpush.msra.mxu0 %v263_v3  ;;  %475 = vmatpush.msra.mxu1 %v263_v3 }
  0x21   : > { %v301_v30 = vld [vmem:[#allocation3] sm:$0x1]  ;;  %v314_v33 = vld [vmem:[#allocation3 + $0x1] sm:$0x1] }
  0x22   : > { %284 = vmatpush.msra.mxu0 %v262_v4  ;;  %476 = vmatpush.msra.mxu1 %v262_v4 }
  0x24   : > { %285 = vmatpush.msra.mxu0 %v261_v5  ;;  %477 = vmatpush.msra.mxu1 %v261_v5 }
  0x26   : > { %286 = vmatpush.msra.mxu0 %v260_v6  ;;  %478 = vmatpush.msra.mxu1 %v260_v6 }
  0x28   : > { %287 = vmatpush.msra.mxu0 %v259_v7  ;;  %479 = vmatpush.msra.mxu1 %v259_v7 }
  0x2a   : > { %288 = vmatpush.msra.mxu0 %v258_v8  ;;  %480 = vmatpush.msra.mxu1 %v258_v8 }
  0x2b   : > { %465 = vmatmul.msk.f32.vlgmr.msra.gmra.mxu0 %vm266_vm1, %v256_v9  ;;  %466 = vmatmul.msk.f32.vlgmr.msra.gmra.mxu1 %vm266_vm1, %v257_v10 }
  0xa8   : > { %v290_v11 = vpop.f32.mrf.mxu0  ;;  %v293_v12 = vpop.f32.mrf.mxu1 }
  0xa9   : > { %299 = vst.msk [vmem:[%s297_s11] sm:$0xff] %vm298_vm2, %v290_v11  ;;  %v302_v13 = vsel %vm298_vm2, %v290_v11, 0.0  ;;  %v315_v14 = vmul.f32 %v290_v11, %v290_v11  ;;  %v303_v15 = vsel %vm298_vm2, %v293_v12, 0.0  ;;  %v316_v16 = vmul.f32 %v293_v12, %v293_v12 }
  0xaa   : > { %300 = vst.msk [vmem:[%s297_s11 + $0x8] sm:$0xff] %vm298_vm2, %v293_v12  ;;  %v304_v17 = vadd.f32 %v303_v15, %v302_v13 }
  0xab   : > { %v317_v18 = vsel %vm298_vm2, %v315_v14, 0.0  ;;  %v318_v19 = vsel %vm298_vm2, %v316_v16, 0.0 }
  0xac   : > { %v305_v20 = vrot.slane %v304_v17, 4  ;;  %v319_v21 = vadd.f32 %v318_v19, %v317_v18 }
  0xae   : > { %v306_v22 = vadd.f32 %v305_v20, %v304_v17  ;;  %v320_v23 = vrot.slane %v319_v21, 4 }
  0xb0   : > { %v307_v24 = vrot.slane %v306_v22, 2  ;;  %v321_v25 = vadd.f32 %v320_v23, %v319_v21 }
  0xb2   : > { %v308_v26 = vadd.f32 %v307_v24, %v306_v22  ;;  %v322_v27 = vrot.slane %v321_v25, 2 }
  0xb4   : > { %v309_v28 = vrot.slane %v308_v26, 1  ;;  %v323_v29 = vadd.f32 %v322_v27, %v321_v25 }
  0xb6   : > { %v310_v31 = vadd.f32 %v309_v28, %v308_v26  ;;  %v324_v32 = vrot.slane %v323_v29, 1 }
  0xb8   : > { %v311_v34 = vadd.f32 %v310_v31, %v301_v30  ;;  %v325_v35 = vadd.f32 %v324_v32, %v323_v29 }
  0xba   : > { %313 = vst.msk [vmem:[#allocation3] sm:$0x1] %vm312_vm3, %v311_v34  ;;  %v326_v36 = vadd.f32 %v325_v35, %v314_v33 }
  0xbc   : > { %327 = vst.msk [vmem:[#allocation3 + $0x1] sm:$0x1] %vm312_vm3, %v326_v36 }
  0xbd PF: > { %p468_p9 = scmp.ne.s32.totalorder %s552_s16, 1 }
  0xbe   : > { %p469_p10 = scmp.ne.s32.totalorder (!%p468_p9), %s548_s15, 0 }
  0xbf   : > { %331 = sbr.rel (%p468_p9) target bundleno = 250 (0xfa), region = 48 }
  0xc4   : > { %335 = sbr.rel (%p469_p10) target bundleno = 237 (0xed), region = 52 }
  0xc9   : > { %v336_v37 = vld [vmem:[#allocation3] sm:$0x1]  ;;  %v338_v38 = vld [vmem:[#allocation3 + $0x1] sm:$0x1]  ;;  %vm356_vm7 = vcmask 253952  }
  0xca   : > { %v337_v39 = vmul.f32 0.015625, %v336_v37  ;;  %v339_v40 = vmul.f32 0.015625, %v338_v38  ;;  %v343_v50 = vld [vmem:[%s698_s2] sm:$0x1] }
  0xcb   : > { %v358_v54 = vld [vmem:[%s699_s3] sm:$0x1] }
  0xcc   : > { %v340_v41 = vmul.f32 %v337_v39, %v337_v39 }
  0xce   : > { %v341_v42 = vsub.f32 %v339_v40, %v340_v41 }
  0xd0   : > { %v342_v43 = vmax.f32 %v341_v42, 0.0 }
  0xd2   : > { %v344_v44 = vadd.f32 1e-05, %v342_v43 }
  0xd4   : > { %522 = vrsqrt.f32 %v344_v44  ;;  %vm351_vm4 = vweird.f32 %v344_v44 }
  0xda   : > { %v523_v45 = vpop.eup %522 }
  0xdb   : > { %v346_v46 = vmul.f32 %v523_v45, %v344_v44  ;;  %vm352_vm5 = vweird.f32 %v523_v45 }
  0xdc   : > { %vm353_vm6 = vmor %vm351_vm4, %vm352_vm5 }
  0xdd   : > { %v347_v47 = vmul.f32 %v523_v45, %v346_v46 }
  0xdf   : > { %v348_v48 = vmul.f32 0.5, %v347_v47 }
  0xe1   : > { %v349_v49 = vsub.f32 1.5, %v348_v48 }
  0xe3   : > { %v350_v51 = vmul.f32 %v523_v45, %v349_v49 }
  0xe5   : > { %v354_v52 = vsel %vm353_vm6, %v523_v45, %v350_v51 }
  0xe6   : > { %v355_v53 = vmul.f32 %v354_v52, %v343_v50 }
  0xe8   : > { %357 = vst.msk [vmem:[#allocation4] sm:$0x1] %vm356_vm7, %v355_v53  ;;  %v359_v55 = vmul.f32 %v355_v53, %v337_v39 }
  0xea   : > { %v360_v56 = vsub.f32 %v358_v54, %v359_v55 }
  0xec   : > { %361 = vst.msk [vmem:[#allocation4 + $0x1] sm:$0x1] %vm356_vm7, %v360_v56 }
  0xed PF: > { %s470_s14 = sshll.u32 %s548_s15, 4  ;;  %vm376_vm8 = vcmask 261120  }
  0xee   : > { %s363_s22 = scalar_lea.vmem [#allocation2], %s470_s14 }
  0xef   : > { %v524_v57 = vld [vmem:[#allocation4] ss:$0 sm:$0xff]  ;;  %v365_v60 = vld [vmem:[%s363_s22 + $0x8] sm:$0xff] }
  0xf0   : > { %v364_v59 = vld [vmem:[%s363_s22] sm:$0xff]  ;;  %v369_v62 = vmul.f32 %v524_v57, %v365_v60 }
  0xf1   : > { %v368_v61 = vmul.f32 %v524_v57, %v364_v59 }
  0xf3   : > { %v525_v58 = vld [vmem:[#allocation4 + $0x1] ss:$0 sm:$0xff] }
  0xf4   : > { %v372_v63 = vadd.f32 %v525_v58, %v368_v61  ;;  %v373_v0 = vadd.f32 %v525_v58, %v369_v62 }
  0xf6   : > { %v374_v1 = vmax.f32 %v372_v63, 0.0  ;;  %v375_v2 = vmax.f32 %v373_v0, 0.0 }
  0xf8   : > { %377 = vst.msk [vmem:[%s639_s10] sm:$0xff] %vm376_vm8, %v374_v1 }
  0xf9   : > { %378 = vst.msk [vmem:[%s639_s10 + $0x8] sm:$0xff] %vm376_vm8, %v375_v2 }
  0xfa PF: > { %s14_s19 = sadd.s32 1, %s564_s19   ;;  %s701_s15 = smov %s556_s17 }
  0xfb   : > { %p11_p11 = scmp.ge.s32.totalorder %s14_s19, 10   ;;  %s702_s16 = smov %s560_s18 }
  0xfc   : > { %s703_s17 = smov %s706_s20  ;;  %s704_s18 = smov %s710_s21 }
  0xfd   :  { %13 = sbr.rel (!%p11_p11) target bundleno = 3 (0x3), region = 84 }

</bundles_post_ra>
